<compile_context>
chip_gen: v7x
topology: tpu7x:2x2x1
jax: 0.10.0
libtpu: 0.0.40
codegen_flags: <defaults>
</compile_context>

<pallas_src>
import math

import jax
import jax.numpy as jnp
import numpy as np
from jax.experimental import pallas as pl
from jax.experimental.pallas import tpu as pltpu

S = 8           # sequence length
B = 2           # batch
D_MODEL = 32    # d_model
NHEAD = 4
HEAD_DIM = D_MODEL // NHEAD
DIM_FF = 64     # dim_feedforward (small for the demo)
LN_EPS = 1e-5

BH = B * NHEAD  # fused (batch, head) leading axis used inside the kernel
BS = B * S      # fused (batch, seq) token axis for the per-token path

# rows of the packed small-vector slab, shape (8, DIM_FF)
_ROW_B1, _ROW_BO, _ROW_B2, _ROW_LN1W, _ROW_LN1B, _ROW_LN2W, _ROW_LN2B = range(7)


def _layer_norm(x, w, b):
    mean = jnp.mean(x, axis=-1, keepdims=True)
    var = jnp.mean((x - mean) ** 2, axis=-1, keepdims=True)
    return (x - mean) * jax.lax.rsqrt(var + LN_EPS) * w + b


def transformer_block_kernel(x_ref, wqkv_ref, bq_ref, wo_ref, w1_ref, w2_ref,
                             vecs_ref, o_ref):
    x = x_ref[...]                                            # (B, S, D)

    # Unpack the small vectors from the single packed VMEM tile.
    b1 = vecs_ref[_ROW_B1:_ROW_B1 + 1, :]                     # (1, DIM_FF)
    bo = vecs_ref[_ROW_BO:_ROW_BO + 1, 0:D_MODEL]             # (1, D)
    b2 = vecs_ref[_ROW_B2:_ROW_B2 + 1, 0:D_MODEL]
    ln1w = vecs_ref[_ROW_LN1W:_ROW_LN1W + 1, 0:D_MODEL]
    ln1b = vecs_ref[_ROW_LN1B:_ROW_LN1B + 1, 0:D_MODEL]
    ln2w = vecs_ref[_ROW_LN2W:_ROW_LN2W + 1, 0:D_MODEL]
    ln2b = vecs_ref[_ROW_LN2B:_ROW_LN2B + 1, 0:D_MODEL]

    # ---- multi-head self attention (heads batched on the leading axis) ----
    # Replicate x along a leading head axis (cheap major-dim vreg copies; no
    # lane slicing / relayout anywhere in the attention path).
    x_bh = jnp.broadcast_to(x[:, None], (B, NHEAD, S, D_MODEL))
    x_bh = x_bh.reshape(BH, S, D_MODEL)                       # (B*NH, S, D)

    wq = wqkv_ref[0]                                          # (B*NH, HD, D)
    wk = wqkv_ref[1]
    wv = wqkv_ref[2]

    # 1/sqrt(HD) is pre-folded into wq/bq; the K bias is dropped (a per-query
    # constant shift cancels under softmax); the V bias is folded into `bo`.
    q = jnp.einsum('nsd,nkd->nsk', x_bh, wq,
                   preferred_element_type=jnp.float32) + bq_ref[...]
    k = jnp.einsum('nsd,nkd->nsk', x_bh, wk,
                   preferred_element_type=jnp.float32)
    v = jnp.einsum('nsd,nkd->nsk', x_bh, wv,
                   preferred_element_type=jnp.float32)        # (B*NH, S, HD)

    scores = jnp.einsum('nsk,ntk->nst', q, k,
                        preferred_element_type=jnp.float32)   # (B*NH, S, S)
    scores = scores - jnp.max(scores, axis=-1, keepdims=True)
    p = jnp.exp(scores)
    p = p / jnp.sum(p, axis=-1, keepdims=True)

    ctx = jnp.einsum('nst,ntk->nsk', p, v,
                     preferred_element_type=jnp.float32)      # (B*NH, S, HD)

    # Per-head output projection; heads recombined by a sum over the leading
    # head axis (no lane-axis concatenate).
    out_h = jnp.einsum('nsk,nkd->nsd', ctx, wo_ref[...],
                       preferred_element_type=jnp.float32)    # (B*NH, S, D)
    out_h = out_h.reshape(B, NHEAD, S, D_MODEL)
    attn = out_h[:, 0]
    for h in range(1, NHEAD):                                 # static unroll
        attn = attn + out_h[:, h]                             # (B, S, D)

    # ---- per-token path on a flattened (B*S, D) view ----------------------
    # (B,S,D)->(B*S,D) merges major axes only: no lane/sublane relayout; the
    # residuals, LayerNorms and the whole FFN become plain 2-D MXU matmuls
    # with un-replicated weights.
    xf = x.reshape(BS, D_MODEL)
    attn_f = attn.reshape(BS, D_MODEL) + bo

    # TODO(synk): dropout layers are identity here (inference semantics).
    y = _layer_norm(xf + attn_f, ln1w, ln1b)                  # add & norm 1

    h1 = jnp.maximum(
        jnp.dot(y, w1_ref[...], preferred_element_type=jnp.float32) + b1, 0.0)
    z = jnp.dot(h1, w2_ref[...], preferred_element_type=jnp.float32) + b2

    out = _layer_norm(y + z, ln2w, ln2b)                      # add & norm 2
    o_ref[...] = out.reshape(B, S, D_MODEL)


def _prepare_inputs(params):
    """Fold / repack the PyTorch-layout parameters for the kernel (pure JAX)."""
    (wqkv, bqkv, wo, bo, ln1w, ln1b, w1, b1, w2, b2, ln2w, ln2b) = params
    scale = 1.0 / math.sqrt(HEAD_DIM)

    def rep(w):  # replicate per-head tensors over batch: (NH, ...) -> (B*NH, ...)
        return jnp.broadcast_to(w[None], (B,) + w.shape).reshape((BH,) + w.shape[1:])

    # per-head Q/K/V weights in (out, in) = (HD, D) orientation; scale folded into Q.
    wq = (wqkv[0 * D_MODEL:1 * D_MODEL] * scale).reshape(NHEAD, HEAD_DIM, D_MODEL)
    wk = wqkv[1 * D_MODEL:2 * D_MODEL].reshape(NHEAD, HEAD_DIM, D_MODEL)
    wv = wqkv[2 * D_MODEL:3 * D_MODEL].reshape(NHEAD, HEAD_DIM, D_MODEL)
    wqkv_n = jnp.stack([rep(wq), rep(wk), rep(wv)], axis=0)   # (3, B*NH, HD, D)

    bq_n = rep((bqkv[0:D_MODEL] * scale).reshape(NHEAD, 1, HEAD_DIM))  # (B*NH,1,HD)
    bv = bqkv[2 * D_MODEL:3 * D_MODEL]

    # out-projection: per-head (HD, D) blocks of Wo^T; V bias folded into the bias.
    wo_n = rep(wo.T.reshape(NHEAD, HEAD_DIM, D_MODEL))        # (B*NH, HD, D)
    bo_f = bo + bv @ wo.T                                     # (D,)

    # FFN weights pre-transposed; NOT replicated per batch (token-flattened path).
    w1_t = w1.T                                               # (D, FF)
    w2_t = w2.T                                               # (FF, D)

    def pad_row(v):
        return jnp.pad(v, (0, DIM_FF - v.shape[0]))

    vecs = jnp.stack([
        pad_row(b1), pad_row(bo_f), pad_row(b2),
        pad_row(ln1w), pad_row(ln1b), pad_row(ln2w), pad_row(ln2b),
        jnp.zeros((DIM_FF,), jnp.float32),
    ], axis=0)                                                # (8, DIM_FF)

    return wqkv_n, bq_n, wo_n, w1_t, w2_t, vecs


def _full_block(shape):
    zeros = (0,) * len(shape)
    return pl.BlockSpec(shape, lambda i, _z=zeros: _z)


def transformer_block(x, params):
    """x: (S, D_MODEL, B) float32 -> (S, D_MODEL, B) float32 (PyTorch layout)."""
    xb = jnp.transpose(x, (2, 0, 1))                          # (B, S, D)
    wqkv_n, bq_n, wo_n, w1_t, w2_t, vecs = _prepare_inputs(params)

    in_specs = [
        _full_block((B, S, D_MODEL)),             # x
        _full_block((3, BH, HEAD_DIM, D_MODEL)),  # packed per-head Q/K/V weights
        _full_block((BH, 1, HEAD_DIM)),           # scaled Q bias
        _full_block((BH, HEAD_DIM, D_MODEL)),     # per-head out-proj weights
        _full_block((D_MODEL, DIM_FF)),           # linear1 weight (pre-transposed)
        _full_block((DIM_FF, D_MODEL)),           # linear2 weight (pre-transposed)
        _full_block((8, DIM_FF)),                 # packed biases / LN params
    ]

    out = pl.pallas_call(
        transformer_block_kernel,
        out_shape=jax.ShapeDtypeStruct((B, S, D_MODEL), jnp.float32),
        grid=(1,),                                # single step: whole slab at once
        in_specs=in_specs,
        out_specs=_full_block((B, S, D_MODEL)),
        compiler_params=pltpu.CompilerParams(
            dimension_semantics=("arbitrary",)),  # one block on one TC by design
    )(xb, wqkv_n, bq_n, wo_n, w1_t, w2_t, vecs)

    # PyTorch output is (S, B, D); the module's final transpose(1, 2) -> (S, D, B)
    return jnp.transpose(out, (1, 2, 0))


def init_params(key):
    """Parameters in PyTorch nn.TransformerEncoderLayer layout."""
    ks = jax.random.split(key, 8)
    s = 0.1
    wqkv = s * jax.random.normal(ks[0], (3 * D_MODEL, D_MODEL), jnp.float32)
    bqkv = s * jax.random.normal(ks[1], (3 * D_MODEL,), jnp.float32)
    wo = s * jax.random.normal(ks[2], (D_MODEL, D_MODEL), jnp.float32)
    bo = s * jax.random.normal(ks[3], (D_MODEL,), jnp.float32)
    ln1w = jnp.ones((D_MODEL,), jnp.float32)
    ln1b = jnp.zeros((D_MODEL,), jnp.float32)
    w1 = s * jax.random.normal(ks[4], (DIM_FF, D_MODEL), jnp.float32)
    b1 = s * jax.random.normal(ks[5], (DIM_FF,), jnp.float32)
    w2 = s * jax.random.normal(ks[6], (D_MODEL, DIM_FF), jnp.float32)
    b2 = s * jax.random.normal(ks[7], (D_MODEL,), jnp.float32)
    ln2w = jnp.ones((D_MODEL,), jnp.float32)
    ln2b = jnp.zeros((D_MODEL,), jnp.float32)
    return (wqkv, bqkv, wo, bo, ln1w, ln1b, w1, b1, w2, b2, ln2w, ln2b)


def reference(x, params):
    """Pure-JAX reference of the same forward (faithful, inference / no dropout)."""
    (wqkv, bqkv, wo, bo, ln1w, ln1b, w1, b1, w2, b2, ln2w, ln2b) = params
    scale = 1.0 / math.sqrt(HEAD_DIM)

    def one(xb):  # xb: (S, D)
        qkv = xb @ wqkv.T + bqkv
        q, k, v = (qkv[:, :D_MODEL], qkv[:, D_MODEL:2 * D_MODEL],
                   qkv[:, 2 * D_MODEL:])
        outs = []
        for h in range(NHEAD):
            sl = slice(h * HEAD_DIM, (h + 1) * HEAD_DIM)
            sc = (q[:, sl] * scale) @ k[:, sl].T
            outs.append(jax.nn.softmax(sc, axis=-1) @ v[:, sl])
        attn = jnp.concatenate(outs, axis=-1) @ wo.T + bo
        y = _layer_norm(xb + attn, ln1w, ln1b)
        z = jnp.maximum(y @ w1.T + b1, 0.0) @ w2.T + b2
        return _layer_norm(y + z, ln2w, ln2b)

    xb = jnp.transpose(x, (2, 0, 1))                 # (B, S, D)
    out = jax.vmap(one)(xb)                          # (B, S, D)
    return jnp.transpose(out, (1, 2, 0))             # (S, D, B)


if __name__ == "__main__":
    key = jax.random.PRNGKey(0)
    kx, kp = jax.random.split(key)
    x = jax.random.normal(kx, (S, D_MODEL, B), jnp.float32)
    params = init_params(kp)

    y = jax.block_until_ready(jax.jit(transformer_block)(x, params))
    y_ref = jax.block_until_ready(reference(x, params))

    assert y.shape == (S, D_MODEL, B), y.shape
    np.testing.assert_allclose(np.asarray(y), np.asarray(y_ref),
                               rtol=1e-4, atol=1e-5)

    print("KERNEL_OK")
</pallas_src>

<mosaic_0001>
module attributes {stable_mosaic.version = 11 : i64} {
  func.func @transformer_block_kernel(%arg0: i32, %arg1: memref<2x8x32xf32, #tpu.memory_space<vmem>>, %arg2: memref<3x8x8x32xf32, #tpu.memory_space<vmem>>, %arg3: memref<8x1x8xf32, #tpu.memory_space<vmem>>, %arg4: memref<8x8x32xf32, #tpu.memory_space<vmem>>, %arg5: memref<32x64xf32, #tpu.memory_space<vmem>>, %arg6: memref<64x32xf32, #tpu.memory_space<vmem>>, %arg7: memref<8x64xf32, #tpu.memory_space<vmem>>, %arg8: memref<2x8x32xf32, #tpu.memory_space<vmem>>) attributes {dimension_semantics = [#tpu.dimension_semantics<arbitrary>], iteration_bounds = array<i64: 1>, scalar_prefetch = 0 : i64, scratch_operands = 0 : i64, tpu.core_type = #tpu.core_type<tc>, window_params = [{pipeline_mode = #tpu.pipeline_mode<synchronous>, transform_indices = @transform_0, window_bounds = array<i64: 2, 8, 32>}, {pipeline_mode = #tpu.pipeline_mode<synchronous>, transform_indices = @transform_1, window_bounds = array<i64: 3, 8, 8, 32>}, {pipeline_mode = #tpu.pipeline_mode<synchronous>, transform_indices = @transform_2, window_bounds = array<i64: 8, 1, 8>}, {pipeline_mode = #tpu.pipeline_mode<synchronous>, transform_indices = @transform_3, window_bounds = array<i64: 8, 8, 32>}, {pipeline_mode = #tpu.pipeline_mode<synchronous>, transform_indices = @transform_4, window_bounds = array<i64: 32, 64>}, {pipeline_mode = #tpu.pipeline_mode<synchronous>, transform_indices = @transform_5, window_bounds = array<i64: 64, 32>}, {pipeline_mode = #tpu.pipeline_mode<synchronous>, transform_indices = @transform_6, window_bounds = array<i64: 8, 64>}, {pipeline_mode = #tpu.pipeline_mode<synchronous>, transform_indices = @transform_7, window_bounds = array<i64: 2, 8, 32>}]} {
    %c0 = arith.constant 0 : index
    %c0_0 = arith.constant 0 : index
    %c0_1 = arith.constant 0 : index
    %0 = vector.load %arg1[%c0, %c0_0, %c0_1] : memref<2x8x32xf32, #tpu.memory_space<vmem>>, vector<2x8x32xf32>
    %c0_2 = arith.constant 0 : index
    %c0_3 = arith.constant 0 : index
    %1 = vector.load %arg7[%c0_2, %c0_3] : memref<8x64xf32, #tpu.memory_space<vmem>>, vector<1x64xf32>
    %c1 = arith.constant 1 : index
    %c0_4 = arith.constant 0 : index
    %2 = vector.load %arg7[%c1, %c0_4] : memref<8x64xf32, #tpu.memory_space<vmem>>, vector<1x32xf32>
    %c2 = arith.constant 2 : index
    %c0_5 = arith.constant 0 : index
    %3 = vector.load %arg7[%c2, %c0_5] : memref<8x64xf32, #tpu.memory_space<vmem>>, vector<1x32xf32>
    %c3 = arith.constant 3 : index
    %c0_6 = arith.constant 0 : index
    %4 = vector.load %arg7[%c3, %c0_6] : memref<8x64xf32, #tpu.memory_space<vmem>>, vector<1x32xf32>
    %c4 = arith.constant 4 : index
    %c0_7 = arith.constant 0 : index
    %5 = vector.load %arg7[%c4, %c0_7] : memref<8x64xf32, #tpu.memory_space<vmem>>, vector<1x32xf32>
    %c5 = arith.constant 5 : index
    %c0_8 = arith.constant 0 : index
    %6 = vector.load %arg7[%c5, %c0_8] : memref<8x64xf32, #tpu.memory_space<vmem>>, vector<1x32xf32>
    %c6 = arith.constant 6 : index
    %c0_9 = arith.constant 0 : index
    %7 = vector.load %arg7[%c6, %c0_9] : memref<8x64xf32, #tpu.memory_space<vmem>>, vector<1x32xf32>
    %8 = vector.shape_cast %0 : vector<2x8x32xf32> to vector<2x1x8x32xf32>
    %9 = vector.shape_cast %8 : vector<2x1x8x32xf32> to vector<2x1x8x32xf32>
    %10 = vector.broadcast %9 : vector<2x1x8x32xf32> to vector<2x4x8x32xf32>
    %11 = vector.shape_cast %10 : vector<2x4x8x32xf32> to vector<8x8x32xf32>
    %c0_10 = arith.constant 0 : index
    %c0_11 = arith.constant 0 : index
    %c0_12 = arith.constant 0 : index
    %c0_13 = arith.constant 0 : index
    %12 = vector.load %arg2[%c0_10, %c0_11, %c0_12, %c0_13] : memref<3x8x8x32xf32, #tpu.memory_space<vmem>>, vector<1x8x8x32xf32>
    %13 = vector.shape_cast %12 : vector<1x8x8x32xf32> to vector<8x8x32xf32>
    %c1_14 = arith.constant 1 : index
    %c0_15 = arith.constant 0 : index
    %c0_16 = arith.constant 0 : index
    %c0_17 = arith.constant 0 : index
    %14 = vector.load %arg2[%c1_14, %c0_15, %c0_16, %c0_17] : memref<3x8x8x32xf32, #tpu.memory_space<vmem>>, vector<1x8x8x32xf32>
    %15 = vector.shape_cast %14 : vector<1x8x8x32xf32> to vector<8x8x32xf32>
    %c2_18 = arith.constant 2 : index
    %c0_19 = arith.constant 0 : index
    %c0_20 = arith.constant 0 : index
    %c0_21 = arith.constant 0 : index
    %16 = vector.load %arg2[%c2_18, %c0_19, %c0_20, %c0_21] : memref<3x8x8x32xf32, #tpu.memory_space<vmem>>, vector<1x8x8x32xf32>
    %17 = vector.shape_cast %16 : vector<1x8x8x32xf32> to vector<8x8x32xf32>
    "tpu.trace_start"() <{level = 10 : i32, message = "nsd,nkd->nsk"}> : () -> ()
    %cst = arith.constant dense<0.000000e+00> : vector<8x8x8xf32>
    %18 = tpu.matmul %11, %13, %cst {dimension_numbers = #tpu.dot_dimension_numbers<[2], [2], [1], [1], [0, 0, 0, 1, 1, 1], [0], [0]>} : vector<8x8x32xf32>, vector<8x8x32xf32>, vector<8x8x8xf32> -> vector<8x8x8xf32>
    "tpu.trace_stop"() : () -> ()
    %c0_22 = arith.constant 0 : index
    %c0_23 = arith.constant 0 : index
    %c0_24 = arith.constant 0 : index
    %19 = vector.load %arg3[%c0_22, %c0_23, %c0_24] : memref<8x1x8xf32, #tpu.memory_space<vmem>>, vector<8x1x8xf32>
    %20 = vector.broadcast %19 : vector<8x1x8xf32> to vector<8x8x8xf32>
    %21 = arith.addf %18, %20 : vector<8x8x8xf32>
    "tpu.trace_start"() <{level = 10 : i32, message = "nsd,nkd->nsk"}> : () -> ()
    %cst_25 = arith.constant dense<0.000000e+00> : vector<8x8x8xf32>
    %22 = tpu.matmul %11, %15, %cst_25 {dimension_numbers = #tpu.dot_dimension_numbers<[2], [2], [1], [1], [0, 0, 0, 1, 1, 1], [0], [0]>} : vector<8x8x32xf32>, vector<8x8x32xf32>, vector<8x8x8xf32> -> vector<8x8x8xf32>
    %cst_26 = arith.constant dense<0.000000e+00> : vector<8x8x8xf32>
    %23 = tpu.matmul %11, %17, %cst_26 {dimension_numbers = #tpu.dot_dimension_numbers<[2], [2], [1], [1], [0, 0, 0, 1, 1, 1], [0], [0]>} : vector<8x8x32xf32>, vector<8x8x32xf32>, vector<8x8x8xf32> -> vector<8x8x8xf32>
    "tpu.trace_stop"() : () -> ()
    "tpu.trace_start"() <{level = 10 : i32, message = "nsk,ntk->nst"}> : () -> ()
    %cst_27 = arith.constant dense<0.000000e+00> : vector<8x8x8xf32>
    %24 = tpu.matmul %21, %22, %cst_27 {dimension_numbers = #tpu.dot_dimension_numbers<[2], [2], [1], [1], [0, 0, 0, 1, 1, 1], [0], [0]>} : vector<8x8x8xf32>, vector<8x8x8xf32>, vector<8x8x8xf32> -> vector<8x8x8xf32>
    "tpu.trace_stop"() : () -> ()
    %cst_28 = arith.constant dense<0xFF800000> : vector<8x8xf32>
    %25 = vector.multi_reduction <maximumf>, %24, %cst_28 [2] : vector<8x8x8xf32> to vector<8x8xf32>
    %26 = vector.shape_cast %25 : vector<8x8xf32> to vector<8x8x1xf32>
    %27 = vector.broadcast %26 : vector<8x8x1xf32> to vector<8x8x8xf32>
    %28 = arith.subf %24, %27 : vector<8x8x8xf32>
    %29 = math.exp %28 : vector<8x8x8xf32>
    %cst_29 = arith.constant dense<0.000000e+00> : vector<8x8xf32>
    %30 = vector.multi_reduction <add>, %29, %cst_29 [2] : vector<8x8x8xf32> to vector<8x8xf32>
    %31 = vector.shape_cast %30 : vector<8x8xf32> to vector<8x8x1xf32>
    %32 = vector.broadcast %31 : vector<8x8x1xf32> to vector<8x8x8xf32>
    %33 = arith.divf %29, %32 : vector<8x8x8xf32>
    "tpu.trace_start"() <{level = 10 : i32, message = "nst,ntk->nsk"}> : () -> ()
    %cst_30 = arith.constant dense<0.000000e+00> : vector<8x8x8xf32>
    %34 = tpu.matmul %33, %23, %cst_30 {dimension_numbers = #tpu.dot_dimension_numbers<[2], [1], [1], [2], [0, 0, 0, 1, 1, 2], [0], [0]>} : vector<8x8x8xf32>, vector<8x8x8xf32>, vector<8x8x8xf32> -> vector<8x8x8xf32>
    "tpu.trace_stop"() : () -> ()
    %c0_31 = arith.constant 0 : index
    %c0_32 = arith.constant 0 : index
    %c0_33 = arith.constant 0 : index
    %35 = vector.load %arg4[%c0_31, %c0_32, %c0_33] : memref<8x8x32xf32, #tpu.memory_space<vmem>>, vector<8x8x32xf32>
    "tpu.trace_start"() <{level = 10 : i32, message = "nsk,nkd->nsd"}> : () -> ()
    %cst_34 = arith.constant dense<0.000000e+00> : vector<8x8x32xf32>
    %36 = tpu.matmul %34, %35, %cst_34 {dimension_numbers = #tpu.dot_dimension_numbers<[2], [1], [1], [2], [0, 0, 0, 1, 1, 2], [0], [0]>} : vector<8x8x8xf32>, vector<8x8x32xf32>, vector<8x8x32xf32> -> vector<8x8x32xf32>
    "tpu.trace_stop"() : () -> ()
    %37 = vector.shape_cast %36 : vector<8x8x32xf32> to vector<2x4x8x32xf32>
    %38 = vector.extract_strided_slice %37 {offsets = [0, 0, 0, 0], sizes = [2, 1, 8, 32], strides = [1, 1, 1, 1]} : vector<2x4x8x32xf32> to vector<2x1x8x32xf32>
    %39 = vector.shape_cast %38 : vector<2x1x8x32xf32> to vector<2x8x32xf32>
    %40 = vector.extract_strided_slice %37 {offsets = [0, 1, 0, 0], sizes = [2, 1, 8, 32], strides = [1, 1, 1, 1]} : vector<2x4x8x32xf32> to vector<2x1x8x32xf32>
    %41 = vector.shape_cast %40 : vector<2x1x8x32xf32> to vector<2x8x32xf32>
    %42 = arith.addf %39, %41 : vector<2x8x32xf32>
    %43 = vector.extract_strided_slice %37 {offsets = [0, 2, 0, 0], sizes = [2, 1, 8, 32], strides = [1, 1, 1, 1]} : vector<2x4x8x32xf32> to vector<2x1x8x32xf32>
    %44 = vector.shape_cast %43 : vector<2x1x8x32xf32> to vector<2x8x32xf32>
    %45 = arith.addf %42, %44 : vector<2x8x32xf32>
    %46 = vector.extract_strided_slice %37 {offsets = [0, 3, 0, 0], sizes = [2, 1, 8, 32], strides = [1, 1, 1, 1]} : vector<2x4x8x32xf32> to vector<2x1x8x32xf32>
    %47 = vector.shape_cast %46 : vector<2x1x8x32xf32> to vector<2x8x32xf32>
    %48 = arith.addf %45, %47 : vector<2x8x32xf32>
    %49 = vector.shape_cast %0 : vector<2x8x32xf32> to vector<16x32xf32>
    %50 = vector.shape_cast %48 : vector<2x8x32xf32> to vector<16x32xf32>
    %51 = vector.broadcast %2 : vector<1x32xf32> to vector<16x32xf32>
    %52 = arith.addf %50, %51 : vector<16x32xf32>
    %53 = arith.addf %49, %52 : vector<16x32xf32>
    %cst_35 = arith.constant dense<0.000000e+00> : vector<16xf32>
    %54 = vector.multi_reduction <add>, %53, %cst_35 [1] : vector<16x32xf32> to vector<16xf32>
    %55 = vector.shape_cast %54 : vector<16xf32> to vector<16x1xf32>
    %cst_36 = arith.constant 3.200000e+01 : f32
    %56 = vector.broadcast %cst_36 : f32 to vector<16x1xf32>
    %57 = arith.divf %55, %56 : vector<16x1xf32>
    %58 = vector.broadcast %57 : vector<16x1xf32> to vector<16x32xf32>
    %59 = arith.subf %53, %58 : vector<16x32xf32>
    %60 = arith.mulf %59, %59 : vector<16x32xf32>
    %cst_37 = arith.constant dense<0.000000e+00> : vector<16xf32>
    %61 = vector.multi_reduction <add>, %60, %cst_37 [1] : vector<16x32xf32> to vector<16xf32>
    %62 = vector.shape_cast %61 : vector<16xf32> to vector<16x1xf32>
    %cst_38 = arith.constant 3.200000e+01 : f32
    %63 = vector.broadcast %cst_38 : f32 to vector<16x1xf32>
    %64 = arith.divf %62, %63 : vector<16x1xf32>
    %65 = vector.broadcast %57 : vector<16x1xf32> to vector<16x32xf32>
    %66 = arith.subf %53, %65 : vector<16x32xf32>
    %cst_39 = arith.constant 9.99999974E-6 : f32
    %67 = vector.broadcast %cst_39 : f32 to vector<16x1xf32>
    %68 = arith.addf %64, %67 : vector<16x1xf32>
    %69 = math.rsqrt %68 : vector<16x1xf32>
    %70 = vector.broadcast %69 : vector<16x1xf32> to vector<16x32xf32>
    %71 = arith.mulf %66, %70 : vector<16x32xf32>
    %72 = vector.broadcast %4 : vector<1x32xf32> to vector<16x32xf32>
    %73 = arith.mulf %71, %72 : vector<16x32xf32>
    %74 = vector.broadcast %5 : vector<1x32xf32> to vector<16x32xf32>
    %75 = arith.addf %73, %74 : vector<16x32xf32>
    %c0_40 = arith.constant 0 : index
    %c0_41 = arith.constant 0 : index
    %76 = vector.load %arg5[%c0_40, %c0_41] : memref<32x64xf32, #tpu.memory_space<vmem>>, vector<32x64xf32>
    %cst_42 = arith.constant dense<0.000000e+00> : vector<16x64xf32>
    %77 = tpu.matmul %75, %76, %cst_42 {dimension_numbers = #tpu.dot_dimension_numbers<[1], [0], [0], [1], [0, 0, 1, 1], [], []>} : vector<16x32xf32>, vector<32x64xf32>, vector<16x64xf32> -> vector<16x64xf32>
    %78 = vector.broadcast %1 : vector<1x64xf32> to vector<16x64xf32>
    %79 = arith.addf %77, %78 : vector<16x64xf32>
    %cst_43 = arith.constant 0.000000e+00 : f32
    %80 = vector.broadcast %cst_43 : f32 to vector<16x64xf32>
    %81 = arith.maximumf %79, %80 : vector<16x64xf32>
    %c0_44 = arith.constant 0 : index
    %c0_45 = arith.constant 0 : index
    %82 = vector.load %arg6[%c0_44, %c0_45] : memref<64x32xf32, #tpu.memory_space<vmem>>, vector<64x32xf32>
    %cst_46 = arith.constant dense<0.000000e+00> : vector<16x32xf32>
    %83 = tpu.matmul %81, %82, %cst_46 {dimension_numbers = #tpu.dot_dimension_numbers<[1], [0], [0], [1], [0, 0, 1, 1], [], []>} : vector<16x64xf32>, vector<64x32xf32>, vector<16x32xf32> -> vector<16x32xf32>
    %84 = vector.broadcast %3 : vector<1x32xf32> to vector<16x32xf32>
    %85 = arith.addf %83, %84 : vector<16x32xf32>
    %86 = arith.addf %75, %85 : vector<16x32xf32>
    %cst_47 = arith.constant dense<0.000000e+00> : vector<16xf32>
    %87 = vector.multi_reduction <add>, %86, %cst_47 [1] : vector<16x32xf32> to vector<16xf32>
    %88 = vector.shape_cast %87 : vector<16xf32> to vector<16x1xf32>
    %cst_48 = arith.constant 3.200000e+01 : f32
    %89 = vector.broadcast %cst_48 : f32 to vector<16x1xf32>
    %90 = arith.divf %88, %89 : vector<16x1xf32>
    %91 = vector.broadcast %90 : vector<16x1xf32> to vector<16x32xf32>
    %92 = arith.subf %86, %91 : vector<16x32xf32>
    %93 = arith.mulf %92, %92 : vector<16x32xf32>
    %cst_49 = arith.constant dense<0.000000e+00> : vector<16xf32>
    %94 = vector.multi_reduction <add>, %93, %cst_49 [1] : vector<16x32xf32> to vector<16xf32>
    %95 = vector.shape_cast %94 : vector<16xf32> to vector<16x1xf32>
    %cst_50 = arith.constant 3.200000e+01 : f32
    %96 = vector.broadcast %cst_50 : f32 to vector<16x1xf32>
    %97 = arith.divf %95, %96 : vector<16x1xf32>
    %98 = vector.broadcast %90 : vector<16x1xf32> to vector<16x32xf32>
    %99 = arith.subf %86, %98 : vector<16x32xf32>
    %cst_51 = arith.constant 9.99999974E-6 : f32
    %100 = vector.broadcast %cst_51 : f32 to vector<16x1xf32>
    %101 = arith.addf %97, %100 : vector<16x1xf32>
    %102 = math.rsqrt %101 : vector<16x1xf32>
    %103 = vector.broadcast %102 : vector<16x1xf32> to vector<16x32xf32>
    %104 = arith.mulf %99, %103 : vector<16x32xf32>
    %105 = vector.broadcast %6 : vector<1x32xf32> to vector<16x32xf32>
    %106 = arith.mulf %104, %105 : vector<16x32xf32>
    %107 = vector.broadcast %7 : vector<1x32xf32> to vector<16x32xf32>
    %108 = arith.addf %106, %107 : vector<16x32xf32>
    %109 = vector.shape_cast %108 : vector<16x32xf32> to vector<2x8x32xf32>
    %c0_52 = arith.constant 0 : index
    %c0_53 = arith.constant 0 : index
    %c0_54 = arith.constant 0 : index
    %110 = vector.load %arg8[%c0_52, %c0_53, %c0_54] : memref<2x8x32xf32, #tpu.memory_space<vmem>>, vector<2x8x32xf32>
    tpu.vector_store %arg8[%c0_52, %c0_53, %c0_54], %109 {strides = array<i32>} : memref<2x8x32xf32, #tpu.memory_space<vmem>>, vector<2x8x32xf32>,
    return
  }
  func.func @transform_0(%arg0: i32) -> (i32, i32, i32) {
    %c0_i32 = arith.constant 0 : i32
    %c0_i32_0 = arith.constant 0 : i32
    %c0_i32_1 = arith.constant 0 : i32
    %c0_i32_2 = arith.constant 0 : i32
    return %c0_i32, %c0_i32_0, %c0_i32_1 : i32, i32, i32
  }
  func.func @transform_1(%arg0: i32) -> (i32, i32, i32, i32) {
    %c0_i32 = arith.constant 0 : i32
    %c0_i32_0 = arith.constant 0 : i32
    %c0_i32_1 = arith.constant 0 : i32
    %c0_i32_2 = arith.constant 0 : i32
    %c0_i32_3 = arith.constant 0 : i32
    return %c0_i32, %c0_i32_0, %c0_i32_1, %c0_i32_2 : i32, i32, i32, i32
  }
  func.func @transform_2(%arg0: i32) -> (i32, i32, i32) {
    %c0_i32 = arith.constant 0 : i32
    %c0_i32_0 = arith.constant 0 : i32
    %c0_i32_1 = arith.constant 0 : i32
    %c0_i32_2 = arith.constant 0 : i32
    return %c0_i32, %c0_i32_0, %c0_i32_1 : i32, i32, i32
  }
  func.func @transform_3(%arg0: i32) -> (i32, i32, i32) {
    %c0_i32 = arith.constant 0 : i32
    %c0_i32_0 = arith.constant 0 : i32
    %c0_i32_1 = arith.constant 0 : i32
    %c0_i32_2 = arith.constant 0 : i32
    return %c0_i32, %c0_i32_0, %c0_i32_1 : i32, i32, i32
  }
  func.func @transform_4(%arg0: i32) -> (i32, i32) {
    %c0_i32 = arith.constant 0 : i32
    %c0_i32_0 = arith.constant 0 : i32
    %c0_i32_1 = arith.constant 0 : i32
    return %c0_i32, %c0_i32_0 : i32, i32
  }
  func.func @transform_5(%arg0: i32) -> (i32, i32) {
    %c0_i32 = arith.constant 0 : i32
    %c0_i32_0 = arith.constant 0 : i32
    %c0_i32_1 = arith.constant 0 : i32
    return %c0_i32, %c0_i32_0 : i32, i32
  }
  func.func @transform_6(%arg0: i32) -> (i32, i32) {
    %c0_i32 = arith.constant 0 : i32
    %c0_i32_0 = arith.constant 0 : i32
    %c0_i32_1 = arith.constant 0 : i32
    return %c0_i32, %c0_i32_0 : i32, i32
  }
  func.func @transform_7(%arg0: i32) -> (i32, i32, i32) {
    %c0_i32 = arith.constant 0 : i32
    %c0_i32_0 = arith.constant 0 : i32
    %c0_i32_1 = arith.constant 0 : i32
    %c0_i32_2 = arith.constant 0 : i32
    return %c0_i32, %c0_i32_0, %c0_i32_1 : i32, i32, i32
  }
}

</mosaic_0001>

<bundles_post_ra>
// kernel: transformer_block.1
= control target key start
LH: loop header
LB: loop body
LE: loop exit
PB: predicated region body
PF: predicated region fallthrough
CT: control target
= control target key end

     0   :  { %vm117_vm0 = vcmask 261120   ;;  %v4596_v0 = vmov 0.0   ;;  %vm4597_vm1 = vmmov 0   ;;  %vm1876_vm2 = vcmask 64512   ;;  %s5127_s1 = inlined_call_operand.vmem [shape: f32[3,8,8,32], index: 1, kind: input, shape index: {}]   ;;  %s5128_s0 = inlined_call_operand.vmem [shape: f32[2,8,32], index: 0, kind: input, shape index: {}]   ;;  %s5129_s2 = inlined_call_operand.vmem [shape: f32[8,1,8], index: 2, kind: input, shape index: {}]   ;;  %s5130_s3 = inlined_call_operand.vmem [shape: f32[8,8,32], index: 3, kind: input, shape index: {}]   ;;  %s5131_s6 = inlined_call_operand.vmem [shape: f32[8,64], index: 6, kind: input, shape index: {}]   ;;  %s5132_s4 = inlined_call_operand.vmem [shape: f32[32,64], index: 4, kind: input, shape index: {}]   ;;  %s5133_s5 = inlined_call_operand.vmem [shape: f32[64,32], index: 5, kind: input, shape index: {}]   ;;  %s5134_s7 = inlined_call_operand.vmem [shape: f32[2,8,32], index: 7, kind: output, shape index: {}]  }
   0x1   :  { %4260 = vmatprep.subr.mxu0 %v4596_v0  ;;  %4275 = vmatprep.subr.mxu1 %v4596_v0  ;;  %v35_v1 = vld [vmem:[%s5127_s1] sm:$0xff]  ;;  %v38_v2 = vld [vmem:[%s5127_s1 + $0x18] sm:$0xff]  ;;  %v36_v4 = vld [vmem:[%s5127_s1 + $0x8] sm:$0xff]  ;;  %vm3905_vm3 = vcmask 523264  }
   0x2   :  { %4261 = vmatpush3.xpose.msk.msra.mxu0 %vm117_vm0, %v35_v1  ;;  %4276 = vmatpush3.xpose.msk.msra.mxu1 %vm117_vm0, %v38_v2  ;;  %v4651_v3 = vld [vmem:[%s5128_s0] sm:$0xff]  ;;  %v40_v5 = vld [vmem:[%s5127_s1 + $0x28] sm:$0xff]  ;;  %v37_v7 = vld [vmem:[%s5127_s1 + $0x10] sm:$0xff] }
   0x3   :  { %4262 = vmatprep.mubr.msk.f32.mxu0 %vm4597_vm1, %v4596_v0  ;;  %4277 = vmatprep.mubr.msk.f32.mxu1 %vm4597_vm1, %v4596_v0  ;;  %v4674_v6 = vld [vmem:[%s5128_s0 + $0x8] sm:$0xff]  ;;  %v42_v8 = vld [vmem:[%s5127_s1 + $0x38] sm:$0xff]  ;;  %v39_v9 = vld [vmem:[%s5127_s1 + $0x20] sm:$0xff] }
   0x4   :  { %4265 = vmatprep.subr.mxu0 %v4596_v0  ;;  %4285 = vmatprep.subr.mxu1 %v4596_v0  ;;  %v4034_v10 = vld [vmem:[%s5127_s1 + $0x48] sm:$0xff]  ;;  %v41_v11 = vld [vmem:[%s5127_s1 + $0x30] sm:$0xff]  ;;  %v4036_v12 = vld [vmem:[%s5127_s1 + $0x58] sm:$0xff] }
   0x5   :  { %4263 = vmatmul.mubr.msk.f32.vlgmr.msra.gmra.mrb[0].mxu0 %vm117_vm0, %v4651_v3  ;;  %4278 = vmatmul.mubr.msk.f32.vlgmr.msra.gmra.mrb[0].mxu1 %vm117_vm0, %v4651_v3  ;;  %v4033_v13 = vld [vmem:[%s5127_s1 + $0x40] sm:$0xff]  ;;  %v4038_v14 = vld [vmem:[%s5127_s1 + $0x68] sm:$0xff]  ;;  %v4035_v15 = vld [vmem:[%s5127_s1 + $0x50] sm:$0xff] }
   0x6   :  { %4266 = vmatpush3.xpose.msk.msra.mxu0 %vm117_vm0, %v36_v4  ;;  %4286 = vmatpush3.xpose.msk.msra.mxu1 %vm117_vm0, %v40_v5  ;;  %v4040_v16 = vld [vmem:[%s5127_s1 + $0x78] sm:$0xff]  ;;  %v4037_v17 = vld [vmem:[%s5127_s1 + $0x60] sm:$0xff]  ;;  %v4042_v18 = vld [vmem:[%s5127_s1 + $0x88] sm:$0xff] }
   0x7   :  { %4267 = vmatprep.mubr.msk.f32.mxu0 %vm4597_vm1, %v4596_v0  ;;  %4287 = vmatprep.mubr.msk.f32.mxu1 %vm4597_vm1, %v4596_v0  ;;  %v4039_v19 = vld [vmem:[%s5127_s1 + $0x70] sm:$0xff]  ;;  %v4044_v20 = vld [vmem:[%s5127_s1 + $0x98] sm:$0xff]  ;;  %v4041_v21 = vld [vmem:[%s5127_s1 + $0x80] sm:$0xff] }
   0x8   :  { %4270 = vmatprep.subr.mxu0 %v4596_v0  ;;  %4295 = vmatprep.subr.mxu1 %v4596_v0  ;;  %v4046_v22 = vld [vmem:[%s5127_s1 + $0xa8] sm:$0xff]  ;;  %v4043_v23 = vld [vmem:[%s5127_s1 + $0x90] sm:$0xff]  ;;  %v4048_v24 = vld [vmem:[%s5127_s1 + $0xb8] sm:$0xff] }
   0x9   :  { %4268 = vmatmul.mubr.msk.f32.vlgmr.msra.gmra.mrb[2].mxu0 %vm117_vm0, %v4651_v3  ;;  %4288 = vmatmul.mubr.msk.f32.vlgmr.msra.gmra.mrb[2].mxu1 %vm117_vm0, %v4674_v6  ;;  %v4045_v25 = vld [vmem:[%s5127_s1 + $0xa0] sm:$0xff]  ;;  %v4047_v26 = vld [vmem:[%s5127_s1 + $0xb0] sm:$0xff] }
   0xa   :  { %4271 = vmatpush3.xpose.msk.msra.mxu0 %vm117_vm0, %v37_v7  ;;  %4296 = vmatpush3.xpose.msk.msra.mxu1 %vm117_vm0, %v42_v8  ;;  %v4050_v39 = vld [vmem:[%s5129_s2 + $0x1] ss:$0 sm:$0xff]  ;;  %v4052_v45 = vld [vmem:[%s5129_s2 + $0x3] ss:$0 sm:$0xff]  ;;  %v4049_v51 = vld [vmem:[%s5129_s2] ss:$0 sm:$0xff] }
   0xb   :  { %4272 = vmatprep.mubr.msk.f32.mxu0 %vm4597_vm1, %v4596_v0  ;;  %4297 = vmatprep.mubr.msk.f32.mxu1 %vm4597_vm1, %v4596_v0  ;;  %v4054_v52 = vld [vmem:[%s5129_s2 + $0x5] ss:$0 sm:$0xff]  ;;  %v4051_v59 = vld [vmem:[%s5129_s2 + $0x2] ss:$0 sm:$0xff]  ;;  %v4056_v60 = vld [vmem:[%s5129_s2 + $0x7] ss:$0 sm:$0xff] }
   0xc   :  { %4280 = vmatprep.subr.mxu0 %v4596_v0  ;;  %4305 = vmatprep.subr.mxu1 %v4596_v0  ;;  %v4053_v5 = vld [vmem:[%s5129_s2 + $0x4] ss:$0 sm:$0xff] }
   0xd   :  { %4273 = vmatmul.mubr.msk.f32.vlgmr.msra.gmra.mrb[4].mxu0 %vm117_vm0, %v4651_v3  ;;  %4298 = vmatmul.mubr.msk.f32.vlgmr.msra.gmra.mrb[4].mxu1 %vm117_vm0, %v4674_v6 }
   0xe   :  { %4281 = vmatpush3.xpose.msk.msra.mxu0 %vm117_vm0, %v39_v9  ;;  %4306 = vmatpush3.xpose.msk.msra.mxu1 %vm117_vm0, %v4034_v10 }
   0xf   :  { %4282 = vmatprep.mubr.msk.f32.mxu0 %vm4597_vm1, %v4596_v0  ;;  %4307 = vmatprep.mubr.msk.f32.mxu1 %vm4597_vm1, %v4596_v0 }
  0x10   :  { %4290 = vmatprep.subr.mxu0 %v4596_v0  ;;  %4315 = vmatprep.subr.mxu1 %v4596_v0 }
  0x11   :  { %4283 = vmatmul.mubr.msk.f32.vlgmr.msra.gmra.mrb[6].mxu0 %vm117_vm0, %v4674_v6  ;;  %4308 = vmatmul.mubr.msk.f32.vlgmr.msra.gmra.mrb[6].mxu1 %vm117_vm0, %v4651_v3 }
  0x12   :  { %4291 = vmatpush3.xpose.msk.msra.mxu0 %vm117_vm0, %v41_v11  ;;  %4316 = vmatpush3.xpose.msk.msra.mxu1 %vm117_vm0, %v4036_v12  ;;  %v4055_v11 = vld [vmem:[%s5129_s2 + $0x6] ss:$0 sm:$0xff] }
  0x13   :  { %4292 = vmatprep.mubr.msk.f32.mxu0 %vm4597_vm1, %v4596_v0  ;;  %4317 = vmatprep.mubr.msk.f32.mxu1 %vm4597_vm1, %v4596_v0 }
  0x14   :  { %4300 = vmatprep.subr.mxu0 %v4596_v0  ;;  %4325 = vmatprep.subr.mxu1 %v4596_v0 }
  0x15   :  { %4293 = vmatmul.mubr.msk.f32.vlgmr.msra.gmra.mrb[8].mxu0 %vm117_vm0, %v4674_v6  ;;  %4318 = vmatmul.mubr.msk.f32.vlgmr.msra.gmra.mrb[8].mxu1 %vm117_vm0, %v4651_v3 }
  0x16   :  { %4301 = vmatpush3.xpose.msk.msra.mxu0 %vm117_vm0, %v4033_v13  ;;  %4326 = vmatpush3.xpose.msk.msra.mxu1 %vm117_vm0, %v4038_v14 }
  0x17   :  { %4302 = vmatprep.mubr.msk.f32.mxu0 %vm4597_vm1, %v4596_v0  ;;  %4327 = vmatprep.mubr.msk.f32.mxu1 %vm4597_vm1, %v4596_v0 }
  0x18   :  { %4310 = vmatprep.subr.mxu0 %v4596_v0  ;;  %4335 = vmatprep.subr.mxu1 %v4596_v0 }
  0x19   :  { %4303 = vmatmul.mubr.msk.f32.vlgmr.msra.gmra.mrb[10].mxu0 %vm117_vm0, %v4651_v3  ;;  %4328 = vmatmul.mubr.msk.f32.vlgmr.msra.gmra.mrb[10].mxu1 %vm117_vm0, %v4674_v6 }
  0x1a   :  { %4311 = vmatpush3.xpose.msk.msra.mxu0 %vm117_vm0, %v4035_v15  ;;  %4336 = vmatpush3.xpose.msk.msra.mxu1 %vm117_vm0, %v4040_v16 }
  0x1b   :  { %4312 = vmatprep.mubr.msk.f32.mxu0 %vm4597_vm1, %v4596_v0  ;;  %4337 = vmatprep.mubr.msk.f32.mxu1 %vm4597_vm1, %v4596_v0 }
  0x1c   :  { %4320 = vmatprep.subr.mxu0 %v4596_v0  ;;  %4345 = vmatprep.subr.mxu1 %v4596_v0 }
  0x1d   :  { %4313 = vmatmul.mubr.msk.f32.vlgmr.msra.gmra.mrb[12].mxu0 %vm117_vm0, %v4651_v3  ;;  %4338 = vmatmul.mubr.msk.f32.vlgmr.msra.gmra.mrb[12].mxu1 %vm117_vm0, %v4674_v6 }
  0x1e   :  { %4321 = vmatpush3.xpose.msk.msra.mxu0 %vm117_vm0, %v4037_v17  ;;  %4322 = vmatprep.mubr.msk.f32.mxu0 %vm4597_vm1, %v4596_v0 }
  0x1f   :  { %4330 = vmatprep.subr.mxu0 %v4596_v0  ;;  %4346 = vmatpush3.xpose.msk.msra.mxu1 %vm117_vm0, %v4042_v18 }
  0x20   :  { %4347 = vmatprep.mubr.msk.f32.mxu1 %vm4597_vm1, %v4596_v0  ;;  %4355 = vmatprep.subr.mxu1 %v4596_v0 }
  0x21   :  { %4323 = vmatmul.mubr.msk.f32.vlgmr.msra.gmra.mrb[14].mxu0 %vm117_vm0, %v4674_v6 }
  0x22   :  { %4331 = vmatpush3.xpose.msk.msra.mxu0 %vm117_vm0, %v4039_v19  ;;  %4332 = vmatprep.mubr.msk.f32.mxu0 %vm4597_vm1, %v4596_v0 }
  0x23   :  { %4348 = vmatmul.mubr.msk.f32.vlgmr.msra.gmra.mrb[14].mxu1 %vm117_vm0, %v4651_v3  ;;  %4340 = vmatprep.subr.mxu0 %v4596_v0 }
  0x24   :  { %4357 = vmatprep.mubr.msk.f32.mxu1 %vm4597_vm1, %v4596_v0  ;;  %4356 = vmatpush3.xpose.msk.msra.mxu1 %vm117_vm0, %v4044_v20 }
  0x25   :  { %4333 = vmatmul.mubr.msk.f32.vlgmr.msra.gmra.mrb[16].mxu0 %vm117_vm0, %v4674_v6  ;;  %4365 = vmatprep.subr.mxu1 %v4596_v0 }
  0x26   :  { %4342 = vmatprep.mubr.msk.f32.mxu0 %vm4597_vm1, %v4596_v0  ;;  %4341 = vmatpush3.xpose.msk.msra.mxu0 %vm117_vm0, %v4041_v21 }
  0x27   :  { %4358 = vmatmul.mubr.msk.f32.vlgmr.msra.gmra.mrb[16].mxu1 %vm117_vm0, %v4651_v3  ;;  %4350 = vmatprep.subr.mxu0 %v4596_v0 }
  0x28   :  { %4366 = vmatpush3.xpose.msk.msra.mxu1 %vm117_vm0, %v4046_v22  ;;  %4367 = vmatprep.mubr.msk.f32.mxu1 %vm4597_vm1, %v4596_v0 }
  0x29   :  { %4375 = vmatprep.subr.mxu1 %v4596_v0  ;;  %4343 = vmatmul.mubr.msk.f32.vlgmr.msra.gmra.mrb[18].mxu0 %vm117_vm0, %v4651_v3 }
  0x2a   :  { %4351 = vmatpush3.xpose.msk.msra.mxu0 %vm117_vm0, %v4043_v23  ;;  %4352 = vmatprep.mubr.msk.f32.mxu0 %vm4597_vm1, %v4596_v0 }
  0x2b   :  { %4368 = vmatmul.mubr.msk.f32.vlgmr.msra.gmra.mrb[18].mxu1 %vm117_vm0, %v4674_v6  ;;  %4360 = vmatprep.subr.mxu0 %v4596_v0 }
  0x2c   :  { %4376 = vmatpush3.xpose.msk.msra.mxu1 %vm117_vm0, %v4048_v24  ;;  %4377 = vmatprep.mubr.msk.f32.mxu1 %vm4597_vm1, %v4596_v0 }
  0x2d   :  { %4353 = vmatmul.mubr.msk.f32.vlgmr.msra.gmra.mrb[20].mxu0 %vm117_vm0, %v4651_v3  ;;  %4385 = vmatprep.subr.mxu1 %v4596_v0 }
  0x2e   :  { %4361 = vmatpush3.xpose.msk.msra.mxu0 %vm117_vm0, %v4045_v25  ;;  %4362 = vmatprep.mubr.msk.f32.mxu0 %vm4597_vm1, %v4596_v0 }
  0x2f   :  { %4378 = vmatmul.mubr.msk.f32.vlgmr.msra.gmra.mrb[20].mxu1 %vm117_vm0, %v4674_v6  ;;  %4370 = vmatprep.subr.mxu0 %v4596_v0 }
  0x30   :  { %4387 = vmatprep.mubr.msk.f32.mxu1 %vm4597_vm1, %v4596_v0 }
  0x31   :  { %4363 = vmatmul.mubr.msk.f32.vlgmr.msra.gmra.mrb[22].mxu0 %vm117_vm0, %v4674_v6 }
  0x32   :  { %4371 = vmatpush3.xpose.msk.msra.mxu0 %vm117_vm0, %v4047_v26  ;;  %4372 = vmatprep.mubr.msk.f32.mxu0 %vm4597_vm1, %v4596_v0 }
  0x33   :  { %4380 = vmatprep.subr.mxu0 %v4596_v0 }
  0x35   :  { %4373 = vmatmul.mubr.msk.f32.vlgmr.msra.gmra.mrb[24].mxu0 %vm117_vm0, %v4674_v6 }
  0x36   :  { %4382 = vmatprep.mubr.msk.f32.mxu0 %vm4597_vm1, %v4596_v0 }
  0xd8   :  { %v190_v27 = vpop.f32.mrb[0].mxu0  ;;  %v409_v28 = vpop.f32.mrb[0].mxu1 }
  0xd9   :  { %v4264_v29 = vpop.f32.mrb[1].mxu0  ;;  %v4279_v30 = vpop.f32.mrb[1].mxu1  ;;  %v410_v50 = vadd.f32 %v4052_v45, %v409_v28  ;;  %v191_v57 = vadd.f32 %v4049_v51, %v190_v27 }
  0xdc   :  { %v263_v31 = vpop.f32.mrb[2].mxu0  ;;  %v558_v32 = vpop.f32.mrb[2].mxu1 }
  0xdd   :  { %v4269_v33 = vpop.f32.mrb[3].mxu0  ;;  %v4289_v34 = vpop.f32.mrb[3].mxu1  ;;  %v264_v44 = vadd.f32 %v4050_v39, %v263_v31  ;;  %v559_v58 = vadd.f32 %v4054_v52, %v558_v32 }
  0xe0   :  { %v336_v35 = vpop.f32.mrb[4].mxu0  ;;  %v704_v36 = vpop.f32.mrb[4].mxu1 }
  0xe1   :  { %v4274_v37 = vpop.f32.mrb[5].mxu0  ;;  %v4299_v38 = vpop.f32.mrb[5].mxu1  ;;  %v337_v2 = vadd.f32 %v4051_v59, %v336_v35  ;;  %v705_v4 = vadd.f32 %v4056_v60, %v704_v36 }
  0xe4   :  { %v485_v40 = vpop.f32.mrb[6].mxu0  ;;  %v850_v41 = vpop.f32.mrb[6].mxu1 }
  0xe5   :  { %v4284_v42 = vpop.f32.mrb[7].mxu0  ;;  %4386 = vmatpush3.xpose.msk.msra.mxu1 %vm1876_vm2, %v850_v41  ;;  %v4309_v43 = vpop.f32.mrb[7].mxu1  ;;  %v486_v9 = vadd.f32 %v4053_v5, %v485_v40 }
  0xe6   :  { %4395 = vmatprep.subr.mxu1 %v4596_v0 }
  0xe8   :  { %v631_v46 = vpop.f32.mrb[8].mxu0  ;;  %v996_v47 = vpop.f32.mrb[8].mxu1  ;;  %4388 = vmatmul.mubr.msk.f32.vlgmr.msra.gmra.mrb[22].mxu1 %vm1876_vm2, %v264_v44 }
  0xe9   :  { %v4294_v48 = vpop.f32.mrb[9].mxu0  ;;  %4396 = vmatpush3.xpose.msk.msra.mxu1 %vm1876_vm2, %v996_v47  ;;  %v4319_v49 = vpop.f32.mrb[9].mxu1  ;;  %4397 = vmatprep.mubr.msk.f32.mxu1 %vm4597_vm1, %v4596_v0  ;;  %v632_v15 = vadd.f32 %v4055_v11, %v631_v46 }
  0xea   :  { %4405 = vmatprep.subr.mxu1 %v4596_v0 }
  0xec   :  { %v777_v53 = vpop.f32.mrb[10].mxu0  ;;  %v1142_v54 = vpop.f32.mrb[10].mxu1  ;;  %4398 = vmatmul.mubr.msk.f32.vlgmr.msra.gmra.mrb[24].mxu1 %vm1876_vm2, %v410_v50 }
  0xed   :  { %v4304_v55 = vpop.f32.mrb[11].mxu0  ;;  %4381 = vmatpush3.xpose.msk.msra.mxu0 %vm1876_vm2, %v777_v53  ;;  %4406 = vmatpush3.xpose.msk.msra.mxu1 %vm1876_vm2, %v1142_v54  ;;  %v4329_v56 = vpop.f32.mrb[11].mxu1 }
  0xee   :  { %4407 = vmatprep.mubr.msk.f32.mxu1 %vm4597_vm1, %v4596_v0  ;;  %4390 = vmatprep.subr.mxu0 %v4596_v0 }
  0xef   :  { %4415 = vmatprep.subr.mxu1 %v4596_v0 }
  0xf0   :  { %v923_v61 = vpop.f32.mrb[12].mxu0  ;;  %v1288_v62 = vpop.f32.mrb[12].mxu1  ;;  %4383 = vmatmul.mubr.msk.f32.vlgmr.msra.gmra.mrb[26].mxu0 %vm1876_vm2, %v191_v57  ;;  %4408 = vmatmul.mubr.msk.f32.vlgmr.msra.gmra.mrb[26].mxu1 %vm1876_vm2, %v559_v58 }
  0xf1   :  { %v4314_v63 = vpop.f32.mrb[13].mxu0  ;;  %4391 = vmatpush3.xpose.msk.msra.mxu0 %vm1876_vm2, %v923_v61  ;;  %4416 = vmatpush3.xpose.msk.msra.mxu1 %vm1876_vm2, %v1288_v62  ;;  %v4339_v1 = vpop.f32.mrb[13].mxu1 }
  0xf2   :  { %4392 = vmatprep.mubr.msk.f32.mxu0 %vm4597_vm1, %v4596_v0  ;;  %4417 = vmatprep.mubr.msk.f32.mxu1 %vm4597_vm1, %v4596_v0 }
  0xf3   :  { %4400 = vmatprep.subr.mxu0 %v4596_v0  ;;  %4425 = vmatprep.subr.mxu1 %v4596_v0 }
  0xf4   :  { %v1069_v7 = vpop.f32.mrb[14].mxu0  ;;  %4393 = vmatmul.mubr.msk.f32.vlgmr.msra.gmra.mrb[28].mxu0 %vm1876_vm2, %v337_v2  ;;  %4418 = vmatmul.mubr.msk.f32.vlgmr.msra.gmra.mrb[28].mxu1 %vm1876_vm2, %v705_v4 }
  0xf5   :  { %4401 = vmatpush3.xpose.msk.msra.mxu0 %vm1876_vm2, %v1069_v7  ;;  %v4324_v8 = vpop.f32.mrb[15].mxu0  ;;  %4402 = vmatprep.mubr.msk.f32.mxu0 %vm4597_vm1, %v4596_v0 }
  0xf6   :  { %4410 = vmatprep.subr.mxu0 %v4596_v0  ;;  %v1434_v10 = vpop.f32.mrb[14].mxu1  ;;  %4427 = vmatprep.mubr.msk.f32.mxu1 %vm4597_vm1, %v4596_v0 }
  0xf7   :  { %v4349_v12 = vpop.f32.mrb[15].mxu1  ;;  %4426 = vmatpush3.msra.mxu1 %v1434_v10 }
  0xf8   :  { %v1215_v13 = vpop.f32.mrb[16].mxu0  ;;  %4403 = vmatmul.mubr.msk.f32.vlgmr.msra.gmra.mrb[30].mxu0 %vm1876_vm2, %v486_v9  ;;  %4435 = vmatprep.subr.mxu1 %v4596_v0 }
  0xf9   :  { %4411 = vmatpush3.xpose.msk.msra.mxu0 %vm1876_vm2, %v1215_v13  ;;  %v4334_v14 = vpop.f32.mrb[17].mxu0  ;;  %4412 = vmatprep.mubr.msk.f32.mxu0 %vm4597_vm1, %v4596_v0 }
  0xfa   :  { %4420 = vmatprep.subr.mxu0 %v4596_v0  ;;  %v4935_v16 = vpop.f32.mrb[16].mxu1 }
  0xfb   :  { %v4359_v17 = vpop.f32.mrb[17].mxu1 }
  0xfc   :  { %4413 = vmatmul.mubr.msk.f32.vlgmr.msra.gmra.mrb[32].mxu0 %vm1876_vm2, %v632_v15  ;;  %v1361_v18 = vpop.f32.mrb[18].mxu0 }
  0xfd   :  { %4422 = vmatprep.mubr.msk.f32.mxu0 %vm4597_vm1, %v4596_v0  ;;  %v4344_v19 = vpop.f32.mrb[19].mxu0  ;;  %4421 = vmatpush3.msra.mxu0 %v1361_v18 }
  0xfe   :  { %v4937_v20 = vpop.f32.mrb[18].mxu1  ;;  %4430 = vmatprep.subr.mxu0 %v4596_v0 }
  0xff   :  { %v4369_v21 = vpop.f32.mrb[19].mxu1 }
 0x100   :  { %v4940_v22 = vpop.f32.mrb[20].mxu0 }
 0x101   :  { %v4354_v23 = vpop.f32.mrb[21].mxu0 }
 0x102   :  { %v4942_v24 = vpop.f32.mrb[20].mxu1 }
 0x103   :  { %v4379_v25 = vpop.f32.mrb[21].mxu1 }
 0x104   :  { %v4944_v26 = vpop.f32.mrb[22].mxu0 }
 0x105   :  { %v4364_v27 = vpop.f32.mrb[23].mxu0 }
 0x108   :  { %v4946_v28 = vpop.f32.mrb[24].mxu0 }
 0x109   :  { %v4374_v29 = vpop.f32.mrb[25].mxu0 }
 0x1bb   :  { %v2025_v30 = vpop.f32.mrb[22].mxu1 }
 0x1bc   :  { %v4389_v31 = vpop.f32.mrb[23].mxu1  ;;  %v2488_v43 = vsel %vm1876_vm2, %v2025_v30, -inf }
 0x1bf   :  { %v2177_v32 = vpop.f32.mrb[24].mxu1 }
 0x1c0   :  { %v4399_v33 = vpop.f32.mrb[25].mxu1  ;;  %v2494_v47 = vsel %vm1876_vm2, %v2177_v32, -inf }
 0x1c3   :  { %v1949_v34 = vpop.f32.mrb[26].mxu0  ;;  %v2329_v35 = vpop.f32.mrb[26].mxu1 }
 0x1c4   :  { %v4384_v36 = vpop.f32.mrb[27].mxu0  ;;  %v4409_v37 = vpop.f32.mrb[27].mxu1  ;;  %v2485_v38 = vsel %vm1876_vm2, %v1949_v34, -inf  ;;  %v2500_v51 = vsel %vm1876_vm2, %v2329_v35, -inf }
 0x1c5   :  { %2486 = vmax.xlane.f32.xlu0 %v2485_v38 }
 0x1c7   :  { %v2101_v39 = vpop.f32.mrb[28].mxu0  ;;  %v2481_v40 = vpop.f32.mrb[28].mxu1 }
 0x1c8   :  { %v4394_v41 = vpop.f32.mrb[29].mxu0  ;;  %v4419_v42 = vpop.f32.mrb[29].mxu1  ;;  %v2491_v44 = vsel %vm1876_vm2, %v2101_v39, -inf  ;;  %v2506_v53 = vsel %vm1876_vm2, %v2481_v40, -inf }
 0x1c9   :  { %2489 = vmax.xlane.f32.xlu0 %v2488_v43  ;;  %2492 = vmax.xlane.f32.xlu1 %v2491_v44 }
 0x1cb   :  { %v2253_v45 = vpop.f32.mrb[30].mxu0 }
 0x1cc   :  { %v4404_v46 = vpop.f32.mrb[31].mxu0  ;;  %v2497_v48 = vsel %vm1876_vm2, %v2253_v45, -inf }
 0x1cd   :  { %2495 = vmax.xlane.f32.xlu1 %v2494_v47  ;;  %2498 = vmax.xlane.f32.xlu0 %v2497_v48 }
 0x1cf   :  { %v2405_v49 = vpop.f32.mrb[32].mxu0 }
 0x1d0   :  { %v4414_v50 = vpop.f32.mrb[33].mxu0  ;;  %v2503_v52 = vsel %vm1876_vm2, %v2405_v49, -inf }
 0x1d1   :  { %2501 = vmax.xlane.f32.xlu1 %v2500_v51  ;;  %2504 = vmax.xlane.f32.xlu0 %v2503_v52 }
 0x1d5   :  { %2507 = vmax.xlane.f32.xlu1 %v2506_v53 }
 0x252   :  { %v2487_v54 = vpop.xlane.xlu0 %2486 }
 0x253   :  { %v2509_v55 = vsub.f32 %v1949_v34, %v2487_v54 }
 0x255   :  { %v2517_v56 = vmul.f32 1.442695, %v2509_v55 }
 0x256   :  { %v2490_v57 = vpop.xlane.xlu0 %2489  ;;  %v2493_v58 = vpop.xlane.xlu1 %2492 }
 0x257   :  { %4556 = vpow2.f32 %v2517_v56  ;;  %v2510_v59 = vsub.f32 %v2025_v30, %v2490_v57  ;;  %v2511_v60 = vsub.f32 %v2101_v39, %v2493_v58 }
 0x259   :  { %v2519_v61 = vmul.f32 1.442695, %v2510_v59  ;;  %v2521_v62 = vmul.f32 1.442695, %v2511_v60  ;;  %v3159_v59 = vld [vmem:[%s5130_s3 + $0x10] sm:$0xff] }
 0x25a   :  { %v2496_v63 = vpop.xlane.xlu1 %2495  ;;  %v2499_v1 = vpop.xlane.xlu0 %2498 }
 0x25b   :  { %4558 = vpow2.f32 %v2519_v61  ;;  %v2512_v2 = vsub.f32 %v2177_v32, %v2496_v63  ;;  %v2513_v4 = vsub.f32 %v2253_v45, %v2499_v1  ;;  %v3161_v1 = vld [vmem:[%s5130_s3 + $0x20] sm:$0xff] }
 0x25c   :  { %4560 = vpow2.f32 %v2521_v62  ;;  %v3160_v62 = vld [vmem:[%s5130_s3 + $0x18] sm:$0xff] }
 0x25d   :  { %v2523_v5 = vmul.f32 1.442695, %v2512_v2  ;;  %v2525_v7 = vmul.f32 1.442695, %v2513_v4 }
 0x25e   :  { %v2502_v8 = vpop.xlane.xlu1 %2501  ;;  %v2505_v9 = vpop.xlane.xlu0 %2504 }
 0x25f   :  { %4562 = vpow2.f32 %v2523_v5  ;;  %v2514_v10 = vsub.f32 %v2329_v35, %v2502_v8  ;;  %v2515_v11 = vsub.f32 %v2405_v49, %v2505_v9  ;;  %v3163_v9 = vld [vmem:[%s5130_s3 + $0x30] sm:$0xff] }
 0x260   :  { %4564 = vpow2.f32 %v2525_v7  ;;  %v3162_v7 = vld [vmem:[%s5130_s3 + $0x28] sm:$0xff] }
 0x261   :  { %v4557_v12 = vpop.eup %4556  ;;  %v2527_v13 = vmul.f32 1.442695, %v2514_v10  ;;  %v2529_v14 = vmul.f32 1.442695, %v2515_v11 }
 0x262   :  { %v2508_v15 = vpop.xlane.xlu1 %2507  ;;  %v2533_v17 = vsel %vm1876_vm2, %v4557_v12, 0.0 }
 0x263   :  { %4566 = vpow2.f32 %v2527_v13  ;;  %v2516_v18 = vsub.f32 %v2481_v40, %v2508_v15  ;;  %2534 = vadd.xlane.f32.xlu0 %v2533_v17  ;;  %v3164_v13 = vld [vmem:[%s5130_s3 + $0x38] sm:$0xff] }
 0x264   :  { %4568 = vpow2.f32 %v2529_v14 }
 0x265   :  { %v4559_v19 = vpop.eup %4558  ;;  %v2531_v21 = vmul.f32 1.442695, %v2516_v18 }
 0x266   :  { %v4561_v23 = vpop.eup %4560  ;;  %v2536_v25 = vsel %vm1876_vm2, %v4559_v19, 0.0 }
 0x267   :  { %4570 = vpow2.f32 %v2531_v21  ;;  %2537 = vadd.xlane.f32.xlu1 %v2536_v25  ;;  %v2539_v27 = vsel %vm1876_vm2, %v4561_v23, 0.0 }
 0x268   :  { %2540 = vadd.xlane.f32.xlu0 %v2539_v27 }
 0x269   :  { %v4563_v29 = vpop.eup %4562 }
 0x26a   :  { %v4565_v30 = vpop.eup %4564  ;;  %v2542_v31 = vsel %vm1876_vm2, %v4563_v29, 0.0 }
 0x26b   :  { %2543 = vadd.xlane.f32.xlu1 %v2542_v31  ;;  %v2545_v32 = vsel %vm1876_vm2, %v4565_v30, 0.0 }
 0x26c   :  { %2546 = vadd.xlane.f32.xlu0 %v2545_v32 }
 0x26d   :  { %v4567_v33 = vpop.eup %4566 }
 0x26e   :  { %v4569_v34 = vpop.eup %4568  ;;  %v2548_v35 = vsel %vm1876_vm2, %v4567_v33, 0.0 }
 0x26f   :  { %2549 = vadd.xlane.f32.xlu1 %v2548_v35  ;;  %v2551_v36 = vsel %vm1876_vm2, %v4569_v34, 0.0 }
 0x270   :  { %2552 = vadd.xlane.f32.xlu0 %v2551_v36 }
 0x271   :  { %v4571_v37 = vpop.eup %4570 }
 0x272   :  { %v2554_v38 = vsel %vm1876_vm2, %v4571_v37, 0.0 }
 0x273   :  { %2555 = vadd.xlane.f32.xlu1 %v2554_v38 }
 0x2f0   :  { %v2535_v39 = vpop.xlane.xlu0 %2534 }
 0x2f1   :  { %4572 = vrcp.f32 %v2535_v39 }
 0x2f4   :  { %v2538_v40 = vpop.xlane.xlu1 %2537 }
 0x2f5   :  { %4574 = vrcp.f32 %v2538_v40  ;;  %v2541_v41 = vpop.xlane.xlu0 %2540 }
 0x2f6   :  { %4576 = vrcp.f32 %v2541_v41 }
 0x2f8   :  { %v2544_v42 = vpop.xlane.xlu1 %2543 }
 0x2f9   :  { %4578 = vrcp.f32 %v2544_v42  ;;  %v2547_v43 = vpop.xlane.xlu0 %2546 }
 0x2fa   :  { %4580 = vrcp.f32 %v2547_v43 }
 0x2fb   :  { %v4573_v44 = vpop.eup %4572 }
 0x2fc   :  { %v2558_v45 = vmul.f32 %v4573_v44, %v4557_v12  ;;  %v2550_v46 = vpop.xlane.xlu1 %2549 }
 0x2fd   :  { %4582 = vrcp.f32 %v2550_v46  ;;  %v2553_v47 = vpop.xlane.xlu0 %2552 }
 0x2fe   :  { %4584 = vrcp.f32 %v2553_v47  ;;  %4423 = vmatmul.mubr.msk.f32.vlgmr.msra.gmra.mrb[34].mxu0 %vm1876_vm2, %v2558_v45 }
 0x2ff   :  { %v4575_v48 = vpop.eup %4574  ;;  %4431 = vmatpush3.msra.mxu0 %v4940_v22  ;;  %4432 = vmatprep.mubr.msk.f32.mxu0 %vm4597_vm1, %v4596_v0 }
 0x300   :  { %v4577_v49 = vpop.eup %4576  ;;  %v2560_v50 = vmul.f32 %v4575_v48, %v4559_v19  ;;  %v2556_v51 = vpop.xlane.xlu1 %2555  ;;  %4440 = vmatprep.subr.mxu0 %v4596_v0 }
 0x301   :  { %v2562_v52 = vmul.f32 %v4577_v49, %v4561_v23  ;;  %4586 = vrcp.f32 %v2556_v51 }
 0x302   :  { %4428 = vmatmul.mubr.msk.f32.vlgmr.msra.gmra.mrb[30].mxu1 %vm1876_vm2, %v2560_v50 }
 0x303   :  { %v4579_v53 = vpop.eup %4578  ;;  %4433 = vmatmul.mubr.msk.f32.vlgmr.msra.gmra.mrb[36].mxu0 %vm1876_vm2, %v2562_v52  ;;  %4436 = vmatpush3.msra.mxu1 %v4935_v16 }
 0x304   :  { %v4581_v54 = vpop.eup %4580  ;;  %v2564_v55 = vmul.f32 %v4579_v53, %v4563_v29  ;;  %4441 = vmatpush3.msra.mxu0 %v4944_v26  ;;  %4437 = vmatprep.mubr.msk.f32.mxu1 %vm4597_vm1, %v4596_v0 }
 0x305   :  { %v2566_v22 = vmul.f32 %v4581_v54, %v4565_v30  ;;  %4442 = vmatprep.mubr.msk.f32.mxu0 %vm4597_vm1, %v4596_v0  ;;  %4445 = vmatprep.subr.mxu1 %v4596_v0 }
 0x306   :  { %4450 = vmatprep.subr.mxu0 %v4596_v0  ;;  %4438 = vmatmul.mubr.msk.f32.vlgmr.msra.gmra.mrb[32].mxu1 %vm1876_vm2, %v2564_v55 }
 0x307   :  { %v4583_v56 = vpop.eup %4582  ;;  %4443 = vmatmul.mubr.msk.f32.vlgmr.msra.gmra.mrb[38].mxu0 %vm1876_vm2, %v2566_v22  ;;  %4446 = vmatpush3.msra.mxu1 %v4937_v20 }
 0x308   :  { %v4585_v16 = vpop.eup %4584  ;;  %v2568_v26 = vmul.f32 %v4583_v56, %v4567_v33  ;;  %4451 = vmatpush3.msra.mxu0 %v4946_v28  ;;  %4447 = vmatprep.mubr.msk.f32.mxu1 %vm4597_vm1, %v4596_v0  ;;  %v3157_v28 = vld [vmem:[%s5130_s3] sm:$0xff] }
 0x309   :  { %v2570_v57 = vmul.f32 %v4585_v16, %v4569_v34  ;;  %4452 = vmatprep.mubr.msk.f32.mxu0 %vm4597_vm1, %v4596_v0  ;;  %4455 = vmatprep.subr.mxu1 %v4596_v0  ;;  %v4137_v34 = vld [vmem:[%s5131_s6 + $0x1] ss:$0 sm:$0xff] }
 0x30a   :  { %4448 = vmatmul.mubr.msk.f32.vlgmr.msra.gmra.mrb[34].mxu1 %vm1876_vm2, %v2568_v26  ;;  %4460 = vmatprep.subr.mxu0 %v4596_v0 }
 0x30b   :  { %v4587_v58 = vpop.eup %4586  ;;  %4453 = vmatmul.mubr.msk.f32.vlgmr.msra.gmra.mrb[40].mxu0 %vm1876_vm2, %v2570_v57  ;;  %4456 = vmatpush3.msra.mxu1 %v4942_v24  ;;  %v3158_v24 = vld [vmem:[%s5130_s3 + $0x8] sm:$0xff] }
 0x30c   :  { %v2572_v20 = vmul.f32 %v4587_v58, %v4571_v37  ;;  %4457 = vmatprep.mubr.msk.f32.mxu1 %vm4597_vm1, %v4596_v0  ;;  %4462 = vmatprep.mubr.msk.f32.mxu0 %vm4597_vm1, %v4596_v0 }
 0x30d   :  { %4465 = vmatprep.subr.mxu1 %v4596_v0  ;;  %4461 = vmatpush3.msra.mxu0 %v3157_v28  ;;  %v3803_v28 = vld [vmem:[%s5132_s4 + $0x8] sm:$0xff] }
 0x30e   :  { %4458 = vmatmul.mubr.msk.f32.vlgmr.msra.gmra.mrb[36].mxu1 %vm1876_vm2, %v2572_v20  ;;  %4470 = vmatprep.subr.mxu0 %v4596_v0 }
 0x30f   :  { %4467 = vmatprep.mubr.msk.f32.mxu1 %vm4597_vm1, %v4596_v0  ;;  %4466 = vmatpush3.msra.mxu1 %v3158_v24 }
 0x310   :  { %4475 = vmatprep.subr.mxu1 %v4596_v0 }
 0x3d1   :  { %v2642_v60 = vpop.f32.mrb[34].mxu0 }
 0x3d2   :  { %v4424_v61 = vpop.f32.mrb[35].mxu0  ;;  %4463 = vmatmul.mubr.msk.f32.vlgmr.msra.gmra.mrb[42].mxu0 %vm1876_vm2, %v2642_v60  ;;  %v3805_v60 = vld [vmem:[%s5132_s4 + $0x18] sm:$0xff] }
 0x3d3   :  { %4471 = vmatpush3.msra.mxu0 %v3159_v59  ;;  %4472 = vmatprep.mubr.msk.f32.mxu0 %vm4597_vm1, %v4596_v0  ;;  %v3804_v59 = vld [vmem:[%s5132_s4 + $0x10] sm:$0xff] }
 0x3d4   :  { %4480 = vmatprep.subr.mxu0 %v4596_v0  ;;  %v4534_v61 = vpack.c.bf16 %v3805_v60, %v3804_v59  ;;  %v4146_v59 = vld [vmem:[%s5131_s6 + $0x5] ss:$0 sm:$0xff] }
 0x3d5   :  { %v2715_v63 = vpop.f32.mrb[30].mxu1 }
 0x3d6   :  { %v2788_v2 = vpop.f32.mrb[36].mxu0  ;;  %v4429_v4 = vpop.f32.mrb[31].mxu1  ;;  %4468 = vmatmul.mubr.msk.f32.vlgmr.msra.gmra.mrb[38].mxu1 %vm1876_vm2, %v2715_v63  ;;  %v3894_v63 = vld [vmem:[%s5133_s5 + $0x8] sm:$0xff] }
 0x3d7   :  { %v4434_v5 = vpop.f32.mrb[37].mxu0  ;;  %4473 = vmatmul.mubr.msk.f32.vlgmr.msra.gmra.mrb[44].mxu0 %vm1876_vm2, %v2788_v2  ;;  %4476 = vmatpush3.msra.mxu1 %v3160_v62  ;;  %v3893_v62 = vld [vmem:[%s5133_s5] sm:$0xff]  ;;  %v3896_v4 = vld [vmem:[%s5133_s5 + $0x18] sm:$0xff] }
 0x3d8   :  { %4477 = vmatprep.mubr.msk.f32.mxu1 %vm4597_vm1, %v4596_v0  ;;  %4481 = vmatpush3.msra.mxu0 %v3161_v1  ;;  %v3895_v1 = vld [vmem:[%s5133_s5 + $0x10] sm:$0xff]  ;;  %v4538_v2 = vpack.c.bf16 %v3894_v63, %v3893_v62  ;;  %v4147_v62 = vld [vmem:[%s5131_s6 + $0x6] ss:$0 sm:$0xff] }
 0x3d9   :  { %v2861_v8 = vpop.f32.mrb[32].mxu1  ;;  %4482 = vmatprep.mubr.msk.f32.mxu0 %vm4597_vm1, %v4596_v0  ;;  %4485 = vmatprep.subr.mxu1 %v4596_v0  ;;  %v4542_v5 = vpack.c.bf16 %v3896_v4, %v3895_v1 }
 0x3da   :  { %v2934_v10 = vpop.f32.mrb[38].mxu0  ;;  %v4439_v11 = vpop.f32.mrb[33].mxu1  ;;  %4478 = vmatmul.mubr.msk.f32.vlgmr.msra.gmra.mrb[40].mxu1 %vm1876_vm2, %v2861_v8  ;;  %4490 = vmatprep.subr.mxu0 %v4596_v0  ;;  %v3898_v8 = vld [vmem:[%s5133_s5 + $0x28] sm:$0xff] }
 0x3db   :  { %v4444_v12 = vpop.f32.mrb[39].mxu0  ;;  %4483 = vmatmul.mubr.msk.f32.vlgmr.msra.gmra.mrb[46].mxu0 %vm1876_vm2, %v2934_v10  ;;  %4486 = vmatpush3.msra.mxu1 %v3162_v7  ;;  %v3897_v7 = vld [vmem:[%s5133_s5 + $0x20] sm:$0xff] }
 0x3dc   :  { %4487 = vmatprep.mubr.msk.f32.mxu1 %vm4597_vm1, %v4596_v0  ;;  %4491 = vmatpush3.msra.mxu0 %v3163_v9  ;;  %v4546_v9 = vpack.c.bf16 %v3898_v8, %v3897_v7 }
 0x3dd   :  { %v3007_v14 = vpop.f32.mrb[34].mxu1  ;;  %4492 = vmatprep.mubr.msk.f32.mxu0 %vm4597_vm1, %v4596_v0  ;;  %4495 = vmatprep.subr.mxu1 %v4596_v0 }
 0x3de   :  { %v3080_v15 = vpop.f32.mrb[40].mxu0  ;;  %v4449_v17 = vpop.f32.mrb[35].mxu1  ;;  %4488 = vmatmul.mubr.msk.f32.vlgmr.msra.gmra.mrb[42].mxu1 %vm1876_vm2, %v3007_v14 }
 0x3df   :  { %v4454_v18 = vpop.f32.mrb[41].mxu0  ;;  %4493 = vmatmul.mubr.msk.f32.vlgmr.msra.gmra.mrb[48].mxu0 %vm1876_vm2, %v3080_v15  ;;  %4496 = vmatpush3.msra.mxu1 %v3164_v13 }
 0x3e0   :  { %4497 = vmatprep.mubr.msk.f32.mxu1 %vm4597_vm1, %v4596_v0  ;;  %4539 = vmatprep.subr.bf16.mxu1 %v4538_v2  ;;  %v4138_v18 = vld [vmem:[%s5131_s6 + $0x3] ss:$0 sm:$0xff] }
 0x3e1   :  { %v3153_v19 = vpop.f32.mrb[36].mxu1 }
 0x3e2   :  { %v4459_v21 = vpop.f32.mrb[37].mxu1  ;;  %4498 = vmatmul.mubr.msk.f32.vlgmr.msra.gmra.mrb[44].mxu1 %vm1876_vm2, %v3153_v19 }
 0x3e3   :  { %4541 = vmatpush3.bf16.msra.mxu1 %v4538_v2  ;;  %v4139_v21 = vld [vmem:[%s5131_s6 + $0x4] ss:$0 sm:$0xff] }
 0x3e4   :  { %4543 = vmatprep.subr.bf16.mxu1 %v4542_v5 }
 0x3e7   :  { %4545 = vmatpush3.bf16.msra.mxu1 %v4542_v5 }
 0x3e8   :  { %4547 = vmatprep.subr.bf16.mxu1 %v4546_v9 }
 0x3eb   :  { %4549 = vmatpush3.bf16.msra.mxu1 %v4546_v9 }
 0x4a5   :  { %v3234_v23 = vpop.f32.mrb[42].mxu0 }
 0x4a6   :  { %v4464_v25 = vpop.f32.mrb[43].mxu0 }
 0x4a9   :  { %v3307_v27 = vpop.f32.mrb[38].mxu1 }
 0x4aa   :  { %v3749_v29 = vadd.f32 %v3307_v27, %v3234_v23  ;;  %v3380_v30 = vpop.f32.mrb[44].mxu0  ;;  %v4469_v31 = vpop.f32.mrb[39].mxu1 }
 0x4ab   :  { %v4474_v32 = vpop.f32.mrb[45].mxu0 }
 0x4ac   :  { %v3751_v33 = vadd.f32 %v3749_v29, %v3380_v30  ;;  %v3899_v32 = vld [vmem:[%s5133_s5 + $0x30] sm:$0xff] }
 0x4ad   :  { %v3453_v35 = vpop.f32.mrb[40].mxu1 }
 0x4ae   :  { %v3753_v36 = vadd.f32 %v3751_v33, %v3453_v35  ;;  %v3526_v37 = vpop.f32.mrb[46].mxu0  ;;  %v4479_v0 = vpop.f32.mrb[41].mxu1  ;;  %v3900_v33 = vld [vmem:[%s5133_s5 + $0x38] sm:$0xff]  ;;  %v4140_v35 = vld [vmem:[%s5131_s6] ss:$0 sm:$0xff] }
 0x4af   :  { %v4484_v38 = vpop.f32.mrb[47].mxu0 }
 0x4b0   :  { %v3759_v39 = vadd.f32 %v4137_v34, %v3753_v36 }
 0x4b1   :  { %v3599_v40 = vpop.f32.mrb[42].mxu1 }
 0x4b2   :  { %v3750_v41 = vadd.f32 %v3599_v40, %v3526_v37  ;;  %v3672_v42 = vpop.f32.mrb[48].mxu0  ;;  %v4489_v43 = vpop.f32.mrb[43].mxu1  ;;  %v3761_v44 = vadd.f32 %v3759_v39, %v4651_v3 }
 0x4b3   :  { %v4494_v45 = vpop.f32.mrb[49].mxu0 }
 0x4b4   :  { %v3752_v46 = vadd.f32 %v3750_v41, %v3672_v42  ;;  %v3763_v47 = vsel %vm117_vm0, %v3761_v44, 0.0  ;;  %v4143_v41 = vld [vmem:[%s5131_s6 + $0x2] ss:$0 sm:$0xff] }
 0x4b5   :  { %v3745_v48 = vpop.f32.mrb[44].mxu1  ;;  %3764 = vadd.xlane.f32.xlu0 %v3763_v47 }
 0x4b6   :  { %v3754_v49 = vadd.f32 %v3752_v46, %v3745_v48  ;;  %v4499_v50 = vpop.f32.mrb[45].mxu1 }
 0x4b8   :  { %v3760_v51 = vadd.f32 %v4137_v34, %v3754_v49  ;;  %v4550_v34 = vpack.c.bf16 %v3900_v33, %v3899_v32 }
 0x4ba   :  { %v3762_v52 = vadd.f32 %v3760_v51, %v4674_v6  ;;  %v3802_v6 = vld [vmem:[%s5132_s4] sm:$0xff]  ;;  %4551 = vmatprep.subr.bf16.mxu1 %v4550_v34 }
 0x4bb   :  { %v4530_v24 = vpack.c.bf16 %v3803_v28, %v3802_v6  ;;  %4553 = vmatpush3.bf16.msra.mxu1 %v4550_v34 }
 0x4bc   :  { %v3766_v53 = vsel %vm117_vm0, %v3762_v52, 0.0 }
 0x4bd   :  { %3767 = vadd.xlane.f32.xlu1 %v3766_v53  ;;  %4531 = vmatprep.subr.bf16.mxu0 %v4530_v24 }
 0x4be   :  { %4533 = vmatpush3.bf16.msra.mxu0 %v4530_v24 }
 0x4bf   :  { %4535 = vmatprep.subr.bf16.mxu0 %v4534_v61 }
 0x4c2   :  { %4537 = vmatpush3.bf16.msra.mxu0 %v4534_v61 }
 0x542   :  { %v3765_v54 = vpop.xlane.xlu0 %3764 }
 0x543   :  { %v3770_v55 = vmul.f32 0.03125, %v3765_v54 }
 0x545   :  { %v3772_v22 = vsub.f32 %v3761_v44, %v3770_v55 }
 0x547   :  { %v3774_v56 = vmul.f32 %v3772_v22, %v3772_v22 }
 0x549   :  { %v3776_v3 = vsel %vm117_vm0, %v3774_v56, 0.0 }
 0x54a   :  { %3777 = vadd.xlane.f32.xlu0 %v3776_v3  ;;  %v3768_v16 = vpop.xlane.xlu1 %3767 }
 0x54b   :  { %v3771_v26 = vmul.f32 0.03125, %v3768_v16 }
 0x54d   :  { %v3773_v57 = vsub.f32 %v3762_v52, %v3771_v26 }
 0x54f   :  { %v3775_v58 = vmul.f32 %v3773_v57, %v3773_v57 }
 0x551   :  { %v3779_v20 = vsel %vm117_vm0, %v3775_v58, 0.0 }
 0x552   :  { %3780 = vadd.xlane.f32.xlu1 %v3779_v20 }
 0x5d7   :  { %v3778_v10 = vpop.xlane.xlu0 %3777 }
 0x5d8   :  { %v3782_v11 = vmul.f32 0.03125, %v3778_v10 }
 0x5da   :  { %v3784_v12 = vadd.f32 1e-05, %v3782_v11 }
 0x5dc   :  { %4588 = vrsqrt.f32 %v3784_v12 }
 0x5df   :  { %v3781_v13 = vpop.xlane.xlu1 %3780 }
 0x5e0   :  { %v3783_v14 = vmul.f32 0.03125, %v3781_v13 }
 0x5e2   :  { %v3785_v15 = vadd.f32 1e-05, %v3783_v14 }
 0x5e4   :  { %4590 = vrsqrt.f32 %v3785_v15 }
 0x5e6   :  { %v4589_v17 = vpop.eup %4588 }
 0x5e7   :  { %v3788_v19 = vmul.f32 %v4589_v17, %v3772_v22 }
 0x5e9   :  { %v3794_v23 = vmul.f32 %v4138_v18, %v3788_v19 }
 0x5eb   :  { %v3800_v25 = vadd.f32 %v4139_v21, %v3794_v23 }
 0x5ed   :  { %4508 = vmatprep.mubr.msk.f32.mxu0 %vm117_vm0, %v3800_v25 }
 0x5ee   :  { %v4591_v27 = vpop.eup %4590 }
 0x5ef   :  { %v3789_v29 = vmul.f32 %v4591_v27, %v3773_v57 }
 0x5f1   :  { %v3795_v30 = vmul.f32 %v4138_v18, %v3789_v29 }
 0x5f3   :  { %v3801_v31 = vadd.f32 %v4139_v21, %v3795_v30 }
 0x5f5   :  { %4509 = vmatmul.mubr.msk.f32.vlgmr.msra.gmra.mrb[50].mxu0 %vm117_vm0, %v3801_v31 }
 0x6c8   :  { %v4510_v36 = vpop.f32.mrb[50].mxu0 }
 0x6c9   :  { %v3888_v37 = vadd.f32 %v4510_v36, %v4140_v35  ;;  %v3882_v0 = vpop.f32.mrb[51].mxu0 }
 0x6ca   :  { %v3883_v38 = vadd.f32 %v4140_v35, %v3882_v0 }
 0x6cb   :  { %v3892_v40 = vmax.f32 %v3888_v37, 0.0 }
 0x6cc   :  { %v3891_v39 = vmax.f32 %v3883_v38, 0.0 }
 0x6ce   :  { %4527 = vmatprep.mubr.msk.f32.mxu1 %vm3905_vm3, %v3891_v39 }
 0x6cf   :  { %4528 = vmatmul.mubr.msk.f32.vlgmr.msra.gmra.mrb[46].mxu1 %vm3905_vm3, %v3892_v40 }
 0x7a2   :  { %v4529_v42 = vpop.f32.mrb[46].mxu1 }
 0x7a3   :  { %v3984_v43 = vadd.f32 %v4529_v42, %v4143_v41  ;;  %v3978_v44 = vpop.f32.mrb[47].mxu1 }
 0x7a4   :  { %v3979_v45 = vadd.f32 %v4143_v41, %v3978_v44 }
 0x7a5   :  { %v3988_v46 = vadd.f32 %v3984_v43, %v3801_v31 }
 0x7a6   :  { %v3987_v47 = vadd.f32 %v3979_v45, %v3800_v25 }
 0x7a7   :  { %v3992_v48 = vsel %vm117_vm0, %v3988_v46, 0.0 }
 0x7a8   :  { %3993 = vadd.xlane.f32.xlu1 %v3992_v48  ;;  %v3989_v49 = vsel %vm117_vm0, %v3987_v47, 0.0 }
 0x7a9   :  { %3990 = vadd.xlane.f32.xlu0 %v3989_v49 }
 0x835   :  { %v3994_v50 = vpop.xlane.xlu1 %3993 }
 0x836   :  { %v3996_v51 = vmul.f32 0.03125, %v3994_v50  ;;  %v3991_v52 = vpop.xlane.xlu0 %3990 }
 0x837   :  { %v3995_v53 = vmul.f32 0.03125, %v3991_v52 }
 0x838   :  { %v3998_v54 = vsub.f32 %v3988_v46, %v3996_v51 }
 0x839   :  { %v3997_v55 = vsub.f32 %v3987_v47, %v3995_v53 }
 0x83a   :  { %v4000_v22 = vmul.f32 %v3998_v54, %v3998_v54 }
 0x83b   :  { %v3999_v56 = vmul.f32 %v3997_v55, %v3997_v55 }
 0x83c   :  { %v4004_v3 = vsel %vm117_vm0, %v4000_v22, 0.0 }
 0x83d   :  { %4005 = vadd.xlane.f32.xlu1 %v4004_v3  ;;  %v4001_v16 = vsel %vm117_vm0, %v3999_v56, 0.0 }
 0x83e   :  { %4002 = vadd.xlane.f32.xlu0 %v4001_v16 }
 0x8ca   :  { %v4006_v26 = vpop.xlane.xlu1 %4005 }
 0x8cb   :  { %v4008_v57 = vmul.f32 0.03125, %v4006_v26  ;;  %v4003_v58 = vpop.xlane.xlu0 %4002 }
 0x8cc   :  { %v4007_v20 = vmul.f32 0.03125, %v4003_v58 }
 0x8cd   :  { %v4010_v6 = vadd.f32 1e-05, %v4008_v57 }
 0x8ce   :  { %v4009_v28 = vadd.f32 1e-05, %v4007_v20 }
 0x8cf   :  { %4592 = vrsqrt.f32 %v4010_v6 }
 0x8d0   :  { %4594 = vrsqrt.f32 %v4009_v28 }
 0x8d9   :  { %v4593_v24 = vpop.eup %4592 }
 0x8da   :  { %v4595_v60 = vpop.eup %4594  ;;  %v4014_v61 = vmul.f32 %v4593_v24, %v3998_v54 }
 0x8db   :  { %v4013_v63 = vmul.f32 %v4595_v60, %v3997_v55 }
 0x8dc   :  { %v4020_v1 = vmul.f32 %v4146_v59, %v4014_v61 }
 0x8dd   :  { %v4019_v2 = vmul.f32 %v4146_v59, %v4013_v63 }
 0x8de   :  { %v4026_v4 = vadd.f32 %v4147_v62, %v4020_v1 }
 0x8df   :  { %v4025_v5 = vadd.f32 %v4147_v62, %v4019_v2 }
 0x8e0   :  { %4028 = vst.msk [vmem:[%s5134_s7 + $0x8] sm:$0xff] %vm117_vm0, %v4026_v4 }
 0x8e1   :  { %4027 = vst.msk [vmem:[%s5134_s7] sm:$0xff] %vm117_vm0, %v4025_v5 }

</bundles_post_ra>
